<compile_context>
chip_gen: v6e
topology: v6e:2x2x1
jax: 0.10.0
libtpu: 0.0.40
codegen_flags: <defaults>
</compile_context>

<pallas_src>
import jax
import jax.numpy as jnp
from jax.experimental import pallas as pl
from jax.experimental.pallas import tpu as pltpu


def _round_up(x, m):
    return ((x + m - 1) // m) * m


def _vmem_capacity_bytes():
    # Generation-aware VMEM capacity (128 MiB on v5e/v6e, 64 MiB on v7x).
    try:
        cap = int(pltpu.get_tpu_info().vmem_capacity_bytes)
        if cap > 0:
            return cap
    except Exception:
        pass
    return 64 * 1024 * 1024  # conservative (v7x-sized) fallback


def _tile_vmem_bytes(tm, tn, tk, f_bytes, w_bytes, out_bytes, with_acc,
                     has_scale):
    fa = 2 * tm * tk * f_bytes             # features tile, double buffered
    wa = 2 * tk * tn * w_bytes             # weight tile,   double buffered
    ba = 2 * tn * 4                        # f32 bias row,  double buffered
    sa = 2 * tn * 4 if has_scale else 0    # f32 dequant-scale row
    oa = 2 * tm * tn * out_bytes           # output tile,   double buffered
    acc = tm * tn * 4 if with_acc else 0   # f32 accumulator scratch
    inter = 2 * tm * tn * 4                # f32 matmul / epilogue intermediates
    return fa + wa + ba + sa + oa + acc + inter


def _choose_tiles_nk(D, V, f_bytes, w_bytes, out_bytes, has_scale, budget,
                     tm_repr=256):
    """Pick (tn, Vp, tk, Dp, with_acc) once per weight matrix.

    tn: lane-dense output tile minimizing estimated per-M-block HBM traffic
        (weights + feature re-reads + output writeback); >= 2 blocks along V
        are kept whenever V allows it so both v7x TensorCores get work even
        when the M axis has a single block (decode).
    tk: whole D in one MXU pass when it fits the VMEM budget (no accumulator
        scratch / zero-init / per-k round trip); otherwise a multiple of 128
        minimizing zero-padding of D.
    """
    def d_plan(tn):
        if D <= 2048 and _tile_vmem_bytes(tm_repr, tn, D, f_bytes, w_bytes,
                                          out_bytes, False, has_scale) <= budget:
            return D, D, False
        cands = [c for c in (512, 384, 256, 128, 640, 768, 1024)
                 if c <= max(D, 128)]
        tk = min(cands, key=lambda c: (_round_up(D, c) - D, -c))
        return tk, _round_up(D, tk), True

    best = None
    for tn in (128, 256, 512, 768, 1024, 1536, 2048, 3072, 4096):
        Vp = _round_up(V, tn)
        if V > 256 and Vp // tn < 2:
            continue                          # keep >= 2 parallel blocks on V
        tk, Dp, with_acc = d_plan(tn)
        if _tile_vmem_bytes(tm_repr, tn, tk, f_bytes, w_bytes, out_bytes,
                            with_acc, has_scale) > budget:
            continue
        traffic = ((Vp // tn) * tm_repr * Dp * f_bytes   # feature re-reads
                   + Dp * Vp * w_bytes                   # weight tiles
                   + tm_repr * Vp * out_bytes)           # output writeback
        key = (traffic, Vp - V, -tn)
        if best is None or key < best[0]:
            best = (key, (tn, Vp, tk, Dp, with_acc))
    if best is None:                          # minimal-tile fallback
        tn = 128
        tk, Dp, with_acc = d_plan(tn)
        return tn, _round_up(V, tn), tk, Dp, with_acc
    return best[1]


class PallasProjection:
    """logits = x @ W + b, with W/b cast/pad/quantization cached at init."""

    def __init__(self, w, b, *, compute_dtype=None, weight_dtype=None,
                 out_dtype=jnp.float32):
        D, V = w.shape
        assert b.shape == (V,)
        self.D, self.V = D, V
        self.out_dtype = jnp.dtype(out_dtype)
        self.compute_dtype = (jnp.dtype(compute_dtype)
                              if compute_dtype is not None
                              else jnp.dtype(w.dtype))
        self.quantized = (weight_dtype is not None
                          and jnp.dtype(weight_dtype) == jnp.dtype(jnp.int8))

        self._f_bytes = self.compute_dtype.itemsize
        self._w_bytes = 1 if self.quantized else self.compute_dtype.itemsize
        self._o_bytes = self.out_dtype.itemsize

        self.vmem_cap = _vmem_capacity_bytes()
        self.budget = int(self.vmem_cap * 0.70)   # ~70% of VMEM working set

        (self.tn, self.Vp, self.tk, self.Dp, self.with_acc) = _choose_tiles_nk(
            D, V, self._f_bytes, self._w_bytes, self._o_bytes,
            self.quantized, self.budget)

        # ---- one-time weight / bias preparation (cached across calls) ------
        w32 = jnp.asarray(w, jnp.float32)
        if self.quantized:
            scale = jnp.maximum(jnp.max(jnp.abs(w32), axis=0), 1e-8) / 127.0
            w_q = jnp.clip(jnp.round(w32 / scale), -127, 127).astype(jnp.int8)
            self.w_eff = w_q.astype(jnp.float32) * scale       # for reference
            w_store = w_q
            s_p = jnp.pad(scale.astype(jnp.float32), (0, self.Vp - V))
            self.scale_p = s_p.reshape(1, self.Vp)
        else:
            self.w_eff = w32
            w_store = w32.astype(self.compute_dtype)
            self.scale_p = None
        if (self.Dp, self.Vp) != (D, V):
            w_store = jnp.pad(w_store, ((0, self.Dp - D), (0, self.Vp - V)))
        self.w_p = w_store
        b_p = jnp.asarray(b, jnp.float32)
        if self.Vp != V:
            b_p = jnp.pad(b_p, (0, self.Vp - V))
        self.b_p = b_p.reshape(1, self.Vp)

        self._single_kernel, self._reduce_kernel = self._build_kernels()

    # ---- kernels ----------------------------------------------------------
    def _build_kernels(self):
        cd = self.compute_dtype
        if self.quantized:
            def single_kernel(f_ref, w_ref, s_ref, b_ref, o_ref):
                acc = jnp.dot(f_ref[...], w_ref[...].astype(cd),
                              preferred_element_type=jnp.float32)
                o_ref[...] = (acc * s_ref[...] + b_ref[...]).astype(o_ref.dtype)

            def reduce_kernel(f_ref, w_ref, s_ref, b_ref, o_ref, acc_ref):
                @pl.when(pl.program_id(2) == 0)
                def _():
                    acc_ref[...] = jnp.zeros_like(acc_ref)
                acc_ref[...] += jnp.dot(f_ref[...], w_ref[...].astype(cd),
                                        preferred_element_type=jnp.float32)
                @pl.when(pl.program_id(2) == pl.num_programs(2) - 1)
                def _():
                    o_ref[...] = (acc_ref[...] * s_ref[...]
                                  + b_ref[...]).astype(o_ref.dtype)
        else:
            def single_kernel(f_ref, w_ref, b_ref, o_ref):
                o_ref[...] = (jnp.dot(f_ref[...], w_ref[...],
                                      preferred_element_type=jnp.float32)
                              + b_ref[...]).astype(o_ref.dtype)

            def reduce_kernel(f_ref, w_ref, b_ref, o_ref, acc_ref):
                @pl.when(pl.program_id(2) == 0)
                def _():
                    acc_ref[...] = jnp.zeros_like(acc_ref)
                acc_ref[...] += jnp.dot(f_ref[...], w_ref[...],
                                        preferred_element_type=jnp.float32)
                @pl.when(pl.program_id(2) == pl.num_programs(2) - 1)
                def _():
                    o_ref[...] = (acc_ref[...] + b_ref[...]).astype(o_ref.dtype)
        return single_kernel, reduce_kernel

    # ---- M-aware tile selection --------------------------------------------
    def _tile_bytes(self, tm):
        return _tile_vmem_bytes(tm, self.tn, self.tk, self._f_bytes,
                                self._w_bytes, self._o_bytes,
                                self.with_acc, self.quantized)

    def _pick_tm(self, M):
        # sublane-pack alignment: 8 for f32 operands, 16 for bf16.
        align = 8 * (4 // max(1, self._f_bytes))
        m_up = _round_up(max(M, 1), align)
        if m_up <= 256:
            return m_up                      # decode: exact, no row padding
        cands = [c for c in (1024, 768, 512, 384, 256) if c <= m_up]
        if m_up <= 1024:
            cands.insert(0, m_up)            # avoid row padding when possible
        for c in cands:
            if self._tile_bytes(c) <= self.budget:
                return c
        return 256                           # guaranteed by tn/tk selection

    # ---- call ---------------------------------------------------------------
    def __call__(self, features_2d):
        M, D = features_2d.shape
        assert D == self.D
        tm = self._pick_tm(M)
        Mp = _round_up(M, tm)

        f = features_2d.astype(self.compute_dtype)
        if (Mp, self.Dp) != (M, D):
            f = jnp.pad(f, ((0, Mp - M), (0, self.Dp - D)))

        needed = self._tile_bytes(tm)
        vmem_limit = max(32 << 20,
                         min(int(0.9 * self.vmem_cap), needed + (16 << 20)))

        operands = [f, self.w_p]
        if self.quantized:
            operands.append(self.scale_p)
        operands.append(self.b_p)

        if not self.with_acc:
            bias_like = pl.BlockSpec((1, self.tn), lambda i, j: (0, j))
            in_specs = [pl.BlockSpec((tm, self.Dp), lambda i, j: (i, 0)),
                        pl.BlockSpec((self.Dp, self.tn), lambda i, j: (0, j))]
            if self.quantized:
                in_specs.append(bias_like)
            in_specs.append(bias_like)
            grid_spec = pltpu.PrefetchScalarGridSpec(
                num_scalar_prefetch=0,
                grid=(Mp // tm, self.Vp // self.tn),
                in_specs=in_specs,
                out_specs=pl.BlockSpec((tm, self.tn), lambda i, j: (i, j)))
            kernel = self._single_kernel
            dims = ("parallel", "parallel")
        else:
            bias_like = pl.BlockSpec((1, self.tn), lambda i, j, k: (0, j))
            in_specs = [pl.BlockSpec((tm, self.tk), lambda i, j, k: (i, k)),
                        pl.BlockSpec((self.tk, self.tn), lambda i, j, k: (k, j))]
            if self.quantized:
                in_specs.append(bias_like)
            in_specs.append(bias_like)
            grid_spec = pltpu.PrefetchScalarGridSpec(
                num_scalar_prefetch=0,
                grid=(Mp // tm, self.Vp // self.tn, self.Dp // self.tk),
                in_specs=in_specs,
                out_specs=pl.BlockSpec((tm, self.tn), lambda i, j, k: (i, j)),
                scratch_shapes=[pltpu.VMEM((tm, self.tn), jnp.float32)])
            kernel = self._reduce_kernel
            dims = ("parallel", "parallel", "arbitrary")

        out = pl.pallas_call(
            kernel,
            out_shape=jax.ShapeDtypeStruct((Mp, self.Vp), self.out_dtype),
            grid_spec=grid_spec,
            compiler_params=pltpu.CompilerParams(
                dimension_semantics=dims, vmem_limit_bytes=vmem_limit),
        )(*operands)

        if (Mp, self.Vp) != (M, self.V):
            out = out[:M, :self.V]
        return out


# ---------------------------------------------------------------------------
# Concrete FairseqDecoder (JAX/Pallas)
# ---------------------------------------------------------------------------
class PallasFairseqDecoder:
    """Minimal concrete FairseqDecoder reproducing the base-class forward:
         x, extra = extract_features(prev_output_tokens, encoder_out)
         x = output_layer(x)
         return (x, extra)
    """

    def __init__(self, dictionary, embed_dim=32, key=None, compute_dtype=None,
                 weight_dtype=None, logits_dtype=jnp.float32):
        self.dictionary = dictionary
        self.onnx_trace = False
        vocab = len(dictionary)
        self.embed_dim = embed_dim
        self.vocab = vocab

        k1, k2, k3 = jax.random.split(key, 3)
        # Deterministic synthetic parameters (no checkpoint load).
        self.embed_tokens = 0.02 * jax.random.normal(
            k1, (vocab, embed_dim), jnp.float32)
        # torch nn.Linear(embed_dim, vocab) weight is (vocab, embed_dim); keep
        # it pre-transposed as (embed_dim, vocab) so the kernel does f @ W.
        self.w_out = 0.02 * jax.random.normal(k2, (embed_dim, vocab), jnp.float32)
        self.b_out = 0.02 * jax.random.normal(k3, (vocab,), jnp.float32)

        # Weight cast / pad / (optional) int8 quantization cached once here.
        self.proj = PallasProjection(
            self.w_out, self.b_out,
            compute_dtype=compute_dtype, weight_dtype=weight_dtype,
            out_dtype=logits_dtype)

    # -- extract_features: plain-JAX gather (glue; no matmul/reduction here) --
    # TODO(synk): fuse this gather into the projection kernel via scalar
    # prefetch of prev_output_tokens (skips one HBM write+read of (M, D)).
    def extract_features(self, prev_output_tokens, encoder_out=None, **kwargs):
        feats = jnp.take(self.embed_tokens, prev_output_tokens, axis=0)  # (B,T,D)
        extra = {"inner_states": [feats], "encoder_out": encoder_out}
        return feats, extra

    # -- output_layer: Pallas MXU kernel ------------------------------------
    def output_layer(self, features, **kwargs):
        B, T, D = features.shape
        logits_2d = self.proj(features.reshape(B * T, D))
        return logits_2d.reshape(B, T, self.vocab)

    def forward(self, prev_output_tokens, encoder_out=None, **kwargs):
        x, extra = self.extract_features(
            prev_output_tokens, encoder_out=encoder_out, **kwargs)
        x = self.output_layer(x)
        return (x, extra)

    # TODO(synk): optionally fuse (log_)softmax into the kernel epilogue when
    # V fits a single lane tile, avoiding a second full pass over (M, V).
    def get_normalized_probs(self, net_output, log_probs, sample=None):
        logits = net_output[0]
        if log_probs:
            return jax.nn.log_softmax(logits, axis=-1)
        return jax.nn.softmax(logits, axis=-1)

    def max_positions(self):
        return 1e6

    def upgrade_state_dict(self, state_dict):
        return state_dict

    def prepare_for_onnx_export_(self):
        self.onnx_trace = True


# ---------------------------------------------------------------------------
if __name__ == "__main__":
    key = jax.random.PRNGKey(0)
    k_tok, k_params, k_tok2, k_params2 = jax.random.split(key, 4)

    # --- small toy config, f32 operands (single-pass kernel path, D <= 2048) --
    B, T, D, V = 2, 8, 32, 256
    dictionary = [f"tok_{i}" for i in range(V)]
    decoder = PallasFairseqDecoder(dictionary, embed_dim=D, key=k_params)

    prev_output_tokens = jax.random.randint(k_tok, (B, T), 0, V, dtype=jnp.int32)
    logits, extra = decoder.forward(prev_output_tokens, encoder_out=None)
    logits = jax.block_until_ready(logits)

    feats_ref = jnp.take(decoder.embed_tokens, prev_output_tokens, axis=0)
    logits_ref = feats_ref @ decoder.w_out + decoder.b_out
    assert logits.shape == (B, T, V)
    assert jnp.allclose(logits, logits_ref, atol=1e-4, rtol=1e-4)

    # --- bf16-operand path (v6e/v7x MXU), f32 accumulation --------------------
    decoder_bf16 = PallasFairseqDecoder(
        dictionary, embed_dim=D, key=k_params, compute_dtype=jnp.bfloat16)
    logits_bf16, _ = decoder_bf16.forward(prev_output_tokens)
    logits_bf16 = jax.block_until_ready(logits_bf16)
    assert jnp.allclose(logits_bf16, logits_ref, atol=5e-3, rtol=5e-2)

    # --- bf16 logits output (halves the (M, V) HBM writeback) -----------------
    decoder_blog = PallasFairseqDecoder(
        dictionary, embed_dim=D, key=k_params, logits_dtype=jnp.bfloat16)
    logits_blog, _ = decoder_blog.forward(prev_output_tokens)
    logits_blog = jax.block_until_ready(logits_blog)
    assert logits_blog.dtype == jnp.bfloat16
    assert jnp.allclose(logits_blog.astype(jnp.float32), logits_ref,
                        atol=2e-3, rtol=2e-2)

    # --- int8 weights + per-column scales (weight-bandwidth-bound decode) -----
    decoder_i8 = PallasFairseqDecoder(
        dictionary, embed_dim=D, key=k_params, weight_dtype=jnp.int8)
    logits_i8, _ = decoder_i8.forward(prev_output_tokens)
    logits_i8 = jax.block_until_ready(logits_i8)
    logits_ref_i8 = feats_ref @ decoder_i8.proj.w_eff + decoder_i8.b_out
    assert jnp.allclose(logits_i8, logits_ref_i8, atol=1e-4, rtol=1e-3)

    # --- larger D (> 2048) exercises the k-reduction kernel; T not /8 and
    # --- V not /256 exercise the row / column padding paths -------------------
    B2, T2, D2, V2 = 2, 7, 2176, 384
    dict2 = [f"tok_{i}" for i in range(V2)]
    decoder2 = PallasFairseqDecoder(dict2, embed_dim=D2, key=k_params2)
    toks2 = jax.random.randint(k_tok2, (B2, T2), 0, V2, dtype=jnp.int32)
    logits2, _ = decoder2.forward(toks2)
    logits2 = jax.block_until_ready(logits2)
    feats2_ref = jnp.take(decoder2.embed_tokens, toks2, axis=0)
    logits2_ref = feats2_ref @ decoder2.w_out + decoder2.b_out
    assert logits2.shape == (B2, T2, V2)
    assert decoder2.proj.with_acc  # reduce-path kernel really was exercised
    assert jnp.allclose(logits2, logits2_ref, atol=5e-4, rtol=1e-3)

    # Exercise get_normalized_probs path as well (plain JAX softmax).
    probs = jax.block_until_ready(
        decoder.get_normalized_probs((logits, extra), log_probs=False))
    assert jnp.allclose(jnp.sum(probs, axis=-1), 1.0, atol=1e-4)

    print("KERNEL_OK")
</pallas_src>

<mosaic_0001>
module attributes {stable_mosaic.version = 11 : i64} {
  func.func @single_kernel(%arg0: i32, %arg1: i32, %arg2: memref<16x32xf32, #tpu.memory_space<vmem>>, %arg3: memref<32x256xf32, #tpu.memory_space<vmem>>, %arg4: memref<1x256xf32, #tpu.memory_space<vmem>>, %arg5: memref<16x256xf32, #tpu.memory_space<vmem>>) attributes {dimension_semantics = [#tpu.dimension_semantics<parallel>, #tpu.dimension_semantics<parallel>], iteration_bounds = array<i64: 1, 1>, scalar_prefetch = 0 : i64, scratch_operands = 0 : i64, tpu.core_type = #tpu.core_type<tc>, window_params = [{transform_indices = @transform_0, window_bounds = array<i64: 16, 32>}, {transform_indices = @transform_1, window_bounds = array<i64: 32, 256>}, {transform_indices = @transform_2, window_bounds = array<i64: 1, 256>}, {transform_indices = @transform_3, window_bounds = array<i64: 16, 256>}]} {
    %c0 = arith.constant 0 : index
    %c0_0 = arith.constant 0 : index
    %0 = vector.load %arg2[%c0, %c0_0] : memref<16x32xf32, #tpu.memory_space<vmem>>, vector<16x32xf32>
    %c0_1 = arith.constant 0 : index
    %c0_2 = arith.constant 0 : index
    %1 = vector.load %arg3[%c0_1, %c0_2] : memref<32x256xf32, #tpu.memory_space<vmem>>, vector<32x256xf32>
    %cst = arith.constant dense<0.000000e+00> : vector<16x256xf32>
    %2 = tpu.matmul %0, %1, %cst {dimension_numbers = #tpu.dot_dimension_numbers<[1], [0], [0], [1], [0, 0, 1, 1], [], []>} : vector<16x32xf32>, vector<32x256xf32>, vector<16x256xf32> -> vector<16x256xf32>
    %c0_3 = arith.constant 0 : index
    %c0_4 = arith.constant 0 : index
    %3 = vector.load %arg4[%c0_3, %c0_4] : memref<1x256xf32, #tpu.memory_space<vmem>>, vector<1x256xf32>
    %4 = vector.broadcast %3 : vector<1x256xf32> to vector<16x256xf32>
    %5 = arith.addf %2, %4 : vector<16x256xf32>
    %c0_5 = arith.constant 0 : index
    %c0_6 = arith.constant 0 : index
    %6 = vector.load %arg5[%c0_5, %c0_6] : memref<16x256xf32, #tpu.memory_space<vmem>>, vector<16x256xf32>
    tpu.vector_store %arg5[%c0_5, %c0_6], %5 {strides = array<i32>} : memref<16x256xf32, #tpu.memory_space<vmem>>, vector<16x256xf32>,
    return
  }
  func.func @transform_0(%arg0: i32, %arg1: i32) -> (i32, i32) {
    %c0_i32 = arith.constant 0 : i32
    %c0_i32_0 = arith.constant 0 : i32
    return %arg0, %c0_i32 : i32, i32
  }
  func.func @transform_1(%arg0: i32, %arg1: i32) -> (i32, i32) {
    %c0_i32 = arith.constant 0 : i32
    %c0_i32_0 = arith.constant 0 : i32
    return %c0_i32, %arg1 : i32, i32
  }
  func.func @transform_2(%arg0: i32, %arg1: i32) -> (i32, i32) {
    %c0_i32 = arith.constant 0 : i32
    %c0_i32_0 = arith.constant 0 : i32
    return %c0_i32, %arg1 : i32, i32
  }
  func.func @transform_3(%arg0: i32, %arg1: i32) -> (i32, i32) {
    %c0_i32 = arith.constant 0 : i32
    return %arg0, %arg1 : i32, i32
  }
}

</mosaic_0001>

<bundles_post_ra>
// kernel: tpu_custom_call.1
= control target key start
LH: loop header
LB: loop body
LE: loop exit
PB: predicated region body
PF: predicated region fallthrough
CT: control target
= control target key end

     0   :  { %8 = vsyncpa [#allocation3], 0  ;;  %s301_s0 = inlined_call_operand.hbm [shape: f32[16,32], index: 0, kind: input, shape index: {}]   ;;  %s302_s1 = inlined_call_operand.hbm [shape: f32[32,256], index: 1, kind: input, shape index: {}]   ;;  %s303_s2 = inlined_call_operand.vmem [shape: f32[1,256], index: 2, kind: input, shape index: {}]   ;;  %s304_s3 = inlined_call_operand.hbm [shape: f32[16,256], index: 3, kind: output, shape index: {}]  }
   0x1   :  { %9 = vsyncpa [#allocation6], 0 }
   0x2   :  { %10 = vsyncpa [#allocation4], 0  ;;  %s255_s12 = smov [#allocation2]  }
   0x3   :  { %s16_s13 = sshll.u32 %s255_s12, 4  ;;  %s17_s13 = int_to_ptr.vmem [resolvable:$true] %s16_s13 }
   0x4   :  { %s197_s14 = scalar_lea.vmem %s17_s13, 256  ;;  %p202_p1 = scmp.lt.s32.totalorder %s17_s13, %s17_s13 }
   0x5   :  { %p198_p0 = scmp.ne.s32.totalorder %s17_s13, %s197_s14  ;;  %p203_p2 = scmp.lt.s32.totalorder %s197_s14, %s197_s14 }
   0x7   :  { %p204_p3 = por %p203_p2, %p202_p1 }
   0x9   :  { %p205_p4 = pnand %p204_p3, %p198_p0 }
   0xb   :  { %208 = shalt.err (!%p205_p4)
}
   0xc   :  { %s256_s15 = smov 128   ;;  %s257_s16 = smov 8  }
   0xd   :  { %22 = dma.hbm_to_vmem [thread:$0]  %s301_s0, 256, %s17_s13, [#allocation3], %s256_s15, %s256_s15, %s257_s16  }
   0xe   :  { %s258_s19 = smov [#allocation5]  }
   0xf   :  { %s28_s20 = sshll.u32 %s258_s19, 4  ;;  %s29_s20 = int_to_ptr.vmem [resolvable:$true] %s28_s20 }
  0x10   :  { %s217_s21 = scalar_lea.vmem %s29_s20, 1024  ;;  %p222_p6 = scmp.lt.s32.totalorder %s29_s20, %s29_s20 }
  0x11   :  { %p218_p5 = scmp.ne.s32.totalorder %s29_s20, %s217_s21  ;;  %p223_p7 = scmp.lt.s32.totalorder %s217_s21, %s217_s21 }
  0x13   :  { %p224_p8 = por %p223_p7, %p222_p6 }
  0x15   :  { %p225_p9 = pnand %p224_p8, %p218_p5 }
  0x17   :  { %228 = shalt.err (!%p225_p9)
}
  0x18   :  { %s259_s22 = smov 256   ;;  %s260_s23 = smov 16  }
  0x19   :  { %34 = dma.hbm_to_vmem [thread:$0]  %s302_s1, 1024, %s29_s20, [#allocation6], %s259_s22, %s259_s22, %s260_s23  }
  0x1a   :  { %249 = dma.done.wait [#allocation3], 256  }
  0x1b   :  { %250 = vsyncadd [#allocation3], 4294967040 }
  0x1c   :  { %251 = dma.done.wait [#allocation6], 1024  }
  0x1d   :  { %252 = vsyncadd [#allocation6], 4294966272  ;;  %v261_v0 = vmov 0.0   ;;  %v52_v1 = vld [vmem:[#allocation5 + $0x38] sm:$0xff]  ;;  %v51_v2 = vld [vmem:[#allocation5 + $0x30] sm:$0xff]  ;;  %vm65_vm0 = vcmask 261120   ;;  %v55_v11 = vlaneseq }
  0x1e   :  { %136 = vmatprep.mubr.f32.mxu0 %v261_v0  ;;  %142 = vmatprep.mubr.f32.mxu1 %v261_v0  ;;  %v50_v3 = vld [vmem:[#allocation5 + $0x28] sm:$0xff]  ;;  %v49_v4 = vld [vmem:[#allocation5 + $0x20] sm:$0xff]  ;;  %v48_v5 = vld [vmem:[#allocation5 + $0x18] sm:$0xff]  ;;  %s262_s26 = smov [#allocation7]  }
  0x1f   :  { %96 = vmatprep.subr.mxu0 %v52_v1  ;;  %173 = vmatprep.subr.mxu1 %v52_v1  ;;  %v47_v6 = vld [vmem:[#allocation5 + $0x10] sm:$0xff]  ;;  %v46_v7 = vld [vmem:[#allocation5 + $0x8] sm:$0xff]  ;;  %v45_v8 = vld [vmem:[#allocation5] sm:$0xff]  ;;  %v56_v12 = vshrl.u32 %v55_v11, 7  ;;  %s158_s27 = sshll.u32 %s262_s26, 4  ;;  %s159_s27 = int_to_ptr.vmem [resolvable:$true] %s158_s27 }
  0x20   :  { %97 = vmatpush1.msra.mxu0 %v51_v2  ;;  %177 = vmatpush1.msra.mxu1 %v51_v2  ;;  %v43_v9 = vld [vmem:[#allocation2] sm:$0xff]  ;;  %v44_v10 = vld [vmem:[#allocation2 + $0x8] sm:$0xff]  ;;  %s229_s28 = scalar_lea.vmem %s159_s27, 512  ;;  %p234_p11 = scmp.lt.s32.totalorder %s159_s27, %s159_s27 }
  0x21   :  { %98 = vmatprep.subr.mxu0 %v50_v3  ;;  %174 = vmatprep.subr.mxu1 %v50_v3  ;;  %v57_v13 = vsub.s32 0, %v56_v12  ;;  %v53_v14 = vld [vmem:[%s303_s2] sm:$0x3]  ;;  %v61_v15 = vsub.s32 1, %v56_v12  ;;  %p230_p10 = scmp.ne.s32.totalorder %s159_s27, %s229_s28  ;;  %p235_p12 = scmp.lt.s32.totalorder %s229_s28, %s229_s28 }
  0x22   :  { %99 = vmatpush1.msra.mxu0 %v49_v4  ;;  %178 = vmatpush1.msra.mxu1 %v49_v4 }
  0x23   :  { %100 = vmatprep.subr.mxu0 %v48_v5  ;;  %175 = vmatprep.subr.mxu1 %v48_v5  ;;  %v58_v16 = vrot.slane %v53_v14, %v57_v13  ;;  %v62_v17 = vrot.slane %v53_v14, %v61_v15  ;;  %p236_p13 = por %p235_p12, %p234_p11 }
  0x24   :  { %101 = vmatpush1.msra.mxu0 %v47_v6  ;;  %179 = vmatpush1.msra.mxu1 %v47_v6 }
  0x25   :  { %102 = vmatprep.subr.mxu0 %v46_v7  ;;  %176 = vmatprep.subr.mxu1 %v46_v7  ;;  %p237_p0 = pnand %p236_p13, %p230_p10 }
  0x26   :  { %103 = vmatpush1.msra.mxu0 %v45_v8  ;;  %180 = vmatpush1.msra.mxu1 %v45_v8 }
  0x27   :  { %171 = vmatmul.mubr.msk.f32.vlgmr.msra.gmra.mxu0 %vm65_vm0, %v43_v9  ;;  %172 = vmatmul.mubr.msk.f32.vlgmr.msra.gmra.mxu1 %vm65_vm0, %v44_v10 }
  0xe7   :  { %v138_v18 = vpop.f32.mrf.mxu0  ;;  %v144_v19 = vpop.f32.mrf.mxu1 }
  0xe8   :  { %v139_v20 = vadd.f32 %v138_v18, %v58_v16  ;;  %v145_v21 = vadd.f32 %v144_v19, %v58_v16 }
  0xe9   :  { %v140_v22 = vpop.f32.mrf.mxu0  ;;  %v146_v23 = vpop.f32.mrf.mxu1 }
  0xea   :  { %149 = vst [vmem:[#allocation7] sm:$0xff] %v139_v20  ;;  %151 = vst [vmem:[#allocation7 + $0x10] sm:$0xff] %v145_v21  ;;  %v141_v24 = vadd.f32 %v140_v22, %v62_v17  ;;  %v147_v25 = vadd.f32 %v146_v23, %v62_v17 }
  0xec   :  { %150 = vst [vmem:[#allocation7 + $0x8] sm:$0xff] %v141_v24  ;;  %152 = vst [vmem:[#allocation7 + $0x18] sm:$0xff] %v147_v25 }
  0xed   :  { %240 = shalt.err (!%p237_p0)
}
  0xee   :  { %164 = dma.vmem_to_hbm [thread:$0]  %s159_s27, 512, %s304_s3, [#allocation4], %s259_s22, %s259_s22, %s260_s23  }
  0xef   :  { %253 = dma.done.wait [#allocation4], 512  }
  0xf0   :  { %254 = vsyncadd [#allocation4], 4294966784 }
  0xf1   :  { %168 = vsyncpa [#allocation3], 1 }
  0xf2   :  { %169 = vsyncpa [#allocation6], 1 }
  0xf3   :  { %170 = vsyncpa [#allocation4], 1 }

</bundles_post_ra>
